<compile_context>
chip_gen: v7x
topology: tpu7x:2x2x1
jax: 0.10.0
libtpu: 0.0.40
codegen_flags: <defaults>
</compile_context>

<pallas_src>
import jax
import jax.numpy as jnp
from jax.experimental import pallas as pl
from jax.experimental.pallas import tpu as pltpu


def _attn_zinb_decoder_kernel(z_ref, wp_ref, bp_ref, wv_ref, bv_ref, wo_ref, bo_ref,
                              wmu_ref, bmu_ref, wth_ref, bth_ref, wpi_ref, bpi_ref,
                              r_ref, p_ref, pi_ref):
    # pre_decoder_net: h = relu(z @ Wp + bp)
    h = jnp.dot(z_ref[...], wp_ref[...], preferred_element_type=jnp.float32)
    h = jnp.maximum(h + bp_ref[...], 0.0)

    # attention with seq_len == 1: softmax over one key == 1  =>  out = out_proj(V_proj(h))
    v = jnp.dot(h, wv_ref[...], preferred_element_type=jnp.float32) + bv_ref[...]
    a = jnp.dot(v, wo_ref[...], preferred_element_type=jnp.float32) + bo_ref[...]

    # post_decoder_net, column-split host-side into lane-dense [mu | theta | pi] blocks
    mu_raw = jnp.dot(a, wmu_ref[...], preferred_element_type=jnp.float32) + bmu_ref[...]
    th_raw = jnp.dot(a, wth_ref[...], preferred_element_type=jnp.float32) + bth_ref[...]
    pi_log = jnp.dot(a, wpi_ref[...], preferred_element_type=jnp.float32) + bpi_ref[...]

    # ZINB parameterization epilogue (only on the returned columns)
    mu = jnp.logaddexp(mu_raw, 0.0)                 # softplus(mu)
    theta = jnp.logaddexp(th_raw, 0.0) + 1e-4       # softplus(theta) + 1e-4
    p = theta / (theta + mu)
    r_ref[...] = theta                              # total_count
    p_ref[...] = jnp.clip(p, 1e-5, 1.0 - 1e-5)      # probs
    pi_ref[...] = 1.0 / (1.0 + jnp.exp(-pi_log))    # zero-inflation probability


def _choose_tile_b(B):
    for cand in (512, 256, 128, 64, 32, 16, 8):
        if B % cand == 0:
            return cand
    return B


def _pad_cols(w, b, width):
    h, f = w.shape
    wp = jnp.zeros((h, width), w.dtype).at[:, :f].set(w)
    bp = jnp.zeros((1, width), b.dtype).at[:, :f].set(b)
    return wp, bp


def attention_zinb_decoder_forward(z, wp, bp, wq, bq, wk, bk, wv, bv, wo, bo,
                                   w_post, b_post, n_features, tile_b=None):
    """Returns (r, p, pi) — the NegativeBinomial total_count / probs and the
    zero-inflation probability that parameterize Independent(ZINB(...), 1).

    wq/bq/wk/bk are accepted for API fidelity with MultiheadAttention, but with the
    length-1 sequence used by the module's forward they do not affect the output.
    """
    del wq, bq, wk, bk  # softmax over a single key == 1; Q/K projections cancel
    B, d_z = z.shape
    H = wp.shape[1]
    F_out = n_features
    assert w_post.shape == (H, 3 * F_out)

    F_pad = ((F_out + 127) // 128) * 128
    w_mu, b_mu = _pad_cols(w_post[:, :F_out], b_post[:, :F_out], F_pad)
    w_th, b_th = _pad_cols(w_post[:, F_out:2 * F_out], b_post[:, F_out:2 * F_out], F_pad)
    w_pi, b_pi = _pad_cols(w_post[:, 2 * F_out:], b_post[:, 2 * F_out:], F_pad)

    if tile_b is None:
        tile_b = _choose_tile_b(B)
    assert B % tile_b == 0
    grid = (pl.cdiv(B, tile_b),)

    def rep(shape):  # replicated (weights / biases): same block for every grid step
        return pl.BlockSpec(shape, lambda i: (0, 0))

    row_in = pl.BlockSpec((tile_b, d_z), lambda i: (i, 0))
    row_out = pl.BlockSpec((tile_b, F_pad), lambda i: (i, 0))

    r_pad, p_pad, pi_pad = pl.pallas_call(
        _attn_zinb_decoder_kernel,
        out_shape=(
            jax.ShapeDtypeStruct((B, F_pad), jnp.float32),
            jax.ShapeDtypeStruct((B, F_pad), jnp.float32),
            jax.ShapeDtypeStruct((B, F_pad), jnp.float32),
        ),
        grid=grid,
        in_specs=[
            row_in,
            rep(wp.shape), rep(bp.shape),
            rep(wv.shape), rep(bv.shape),
            rep(wo.shape), rep(bo.shape),
            rep(w_mu.shape), rep(b_mu.shape),
            rep(w_th.shape), rep(b_th.shape),
            rep(w_pi.shape), rep(b_pi.shape),
        ],
        out_specs=(row_out, row_out, row_out),
        compiler_params=pltpu.CompilerParams(dimension_semantics=("parallel",)),
    )(z, wp, bp, wv, bv, wo, bo, w_mu, b_mu, w_th, b_th, w_pi, b_pi)

    # Contiguous (non-strided) slices back to the true feature width.
    return r_pad[:, :F_out], p_pad[:, :F_out], pi_pad[:, :F_out]


def _reference(z, wp, bp, wq, bq, wk, bk, wv, bv, wo, bo, w_post, b_post,
               n_features, num_heads):
    """Pure-JAX reference that mirrors the torch forward, including full MHA math."""
    h = jnp.maximum(z @ wp + bp, 0.0)
    x = h[:, None, :]                                  # unsqueeze(1): (B, 1, H)
    q = x @ wq + bq
    k = x @ wk + bk
    v = x @ wv + bv
    B, S, H = q.shape
    dh = H // num_heads

    def heads(t):
        return t.reshape(B, S, num_heads, dh).transpose(0, 2, 1, 3)

    qh, kh, vh = heads(q), heads(k), heads(v)
    scores = (qh @ kh.transpose(0, 1, 3, 2)) / jnp.sqrt(jnp.float32(dh))
    w = jax.nn.softmax(scores, axis=-1)                # == 1.0 (single key)
    ctx = (w @ vh).transpose(0, 2, 1, 3).reshape(B, S, H)
    a = (ctx @ wo + bo)[:, 0, :]                       # squeeze(1)

    o = a @ w_post + b_post
    mu_raw = o[:, :n_features]
    th_raw = o[:, n_features:2 * n_features]
    pi_log = o[:, 2 * n_features:]
    mu = jnp.logaddexp(mu_raw, 0.0)
    theta = jnp.logaddexp(th_raw, 0.0) + 1e-4
    p = jnp.clip(theta / (theta + mu), 1e-5, 1.0 - 1e-5)
    pi = 1.0 / (1.0 + jnp.exp(-pi_log))
    return theta, p, pi


if __name__ == "__main__":
    # Small shapes consistent with the module: z is (batch, d_z).
    B, d_z, H, F_out, num_heads = 16, 16, 64, 50, 4

    key = jax.random.PRNGKey(0)
    ks = jax.random.split(key, 13)
    z = jax.random.normal(ks[0], (B, d_z), dtype=jnp.float32)
    wp = jax.random.normal(ks[1], (d_z, H), dtype=jnp.float32) / jnp.sqrt(d_z)
    bp = jax.random.normal(ks[2], (1, H), dtype=jnp.float32) * 0.01
    wq = jax.random.normal(ks[3], (H, H), dtype=jnp.float32) / jnp.sqrt(H)
    bq = jax.random.normal(ks[4], (1, H), dtype=jnp.float32) * 0.01
    wk = jax.random.normal(ks[5], (H, H), dtype=jnp.float32) / jnp.sqrt(H)
    bk = jax.random.normal(ks[6], (1, H), dtype=jnp.float32) * 0.01
    wv = jax.random.normal(ks[7], (H, H), dtype=jnp.float32) / jnp.sqrt(H)
    bv = jax.random.normal(ks[8], (1, H), dtype=jnp.float32) * 0.01
    wo = jax.random.normal(ks[9], (H, H), dtype=jnp.float32) / jnp.sqrt(H)
    bo = jax.random.normal(ks[10], (1, H), dtype=jnp.float32) * 0.01
    w_post = jax.random.normal(ks[11], (H, 3 * F_out), dtype=jnp.float32) / jnp.sqrt(H)
    b_post = jax.random.normal(ks[12], (1, 3 * F_out), dtype=jnp.float32) * 0.01

    r, p, pi = attention_zinb_decoder_forward(
        z, wp, bp, wq, bq, wk, bk, wv, bv, wo, bo, w_post, b_post, F_out)
    jax.block_until_ready((r, p, pi))

    rr, rp, rpi = _reference(z, wp, bp, wq, bq, wk, bk, wv, bv, wo, bo,
                             w_post, b_post, F_out, num_heads)

    assert r.shape == (B, F_out) and p.shape == (B, F_out) and pi.shape == (B, F_out)
    assert jnp.allclose(r, rr, atol=1e-4, rtol=1e-4)
    assert jnp.allclose(p, rp, atol=1e-4, rtol=1e-4)
    assert jnp.allclose(pi, rpi, atol=1e-4, rtol=1e-4)

    # TODO(synk): the torch.distributions objects (NegativeBinomial, ZINB, Independent)
    # and their sample()/log_prob() are downstream consumers of (r, p, pi) and are not
    # part of this forward-pass kernel.
    print("KERNEL_OK")
</pallas_src>

<mosaic_0001>
module attributes {stable_mosaic.version = 11 : i64} {
  func.func @_attn_zinb_decoder_kernel(%arg0: i32, %arg1: memref<16x16xf32, #tpu.memory_space<vmem>>, %arg2: memref<16x64xf32, #tpu.memory_space<vmem>>, %arg3: memref<1x64xf32, #tpu.memory_space<vmem>>, %arg4: memref<64x64xf32, #tpu.memory_space<vmem>>, %arg5: memref<1x64xf32, #tpu.memory_space<vmem>>, %arg6: memref<64x64xf32, #tpu.memory_space<vmem>>, %arg7: memref<1x64xf32, #tpu.memory_space<vmem>>, %arg8: memref<64x128xf32, #tpu.memory_space<vmem>>, %arg9: memref<1x128xf32, #tpu.memory_space<vmem>>, %arg10: memref<64x128xf32, #tpu.memory_space<vmem>>, %arg11: memref<1x128xf32, #tpu.memory_space<vmem>>, %arg12: memref<64x128xf32, #tpu.memory_space<vmem>>, %arg13: memref<1x128xf32, #tpu.memory_space<vmem>>, %arg14: memref<16x128xf32, #tpu.memory_space<vmem>>, %arg15: memref<16x128xf32, #tpu.memory_space<vmem>>, %arg16: memref<16x128xf32, #tpu.memory_space<vmem>>) attributes {dimension_semantics = [#tpu.dimension_semantics<parallel>], iteration_bounds = array<i64: 1>, scalar_prefetch = 0 : i64, scratch_operands = 0 : i64, tpu.core_type = #tpu.core_type<tc>, window_params = [{transform_indices = @transform_0, window_bounds = array<i64: 16, 16>}, {pipeline_mode = #tpu.pipeline_mode<synchronous>, transform_indices = @transform_1, window_bounds = array<i64: 16, 64>}, {pipeline_mode = #tpu.pipeline_mode<synchronous>, transform_indices = @transform_2, window_bounds = array<i64: 1, 64>}, {pipeline_mode = #tpu.pipeline_mode<synchronous>, transform_indices = @transform_3, window_bounds = array<i64: 64, 64>}, {pipeline_mode = #tpu.pipeline_mode<synchronous>, transform_indices = @transform_4, window_bounds = array<i64: 1, 64>}, {pipeline_mode = #tpu.pipeline_mode<synchronous>, transform_indices = @transform_5, window_bounds = array<i64: 64, 64>}, {pipeline_mode = #tpu.pipeline_mode<synchronous>, transform_indices = @transform_6, window_bounds = array<i64: 1, 64>}, {pipeline_mode = #tpu.pipeline_mode<synchronous>, transform_indices = @transform_7, window_bounds = array<i64: 64, 128>}, {pipeline_mode = #tpu.pipeline_mode<synchronous>, transform_indices = @transform_8, window_bounds = array<i64: 1, 128>}, {pipeline_mode = #tpu.pipeline_mode<synchronous>, transform_indices = @transform_9, window_bounds = array<i64: 64, 128>}, {pipeline_mode = #tpu.pipeline_mode<synchronous>, transform_indices = @transform_10, window_bounds = array<i64: 1, 128>}, {pipeline_mode = #tpu.pipeline_mode<synchronous>, transform_indices = @transform_11, window_bounds = array<i64: 64, 128>}, {pipeline_mode = #tpu.pipeline_mode<synchronous>, transform_indices = @transform_12, window_bounds = array<i64: 1, 128>}, {transform_indices = @transform_13, window_bounds = array<i64: 16, 128>}, {transform_indices = @transform_14, window_bounds = array<i64: 16, 128>}, {transform_indices = @transform_15, window_bounds = array<i64: 16, 128>}]} {
    %c0 = arith.constant 0 : index
    %c0_0 = arith.constant 0 : index
    %0 = vector.load %arg1[%c0, %c0_0] : memref<16x16xf32, #tpu.memory_space<vmem>>, vector<16x16xf32>
    %c0_1 = arith.constant 0 : index
    %c0_2 = arith.constant 0 : index
    %1 = vector.load %arg2[%c0_1, %c0_2] : memref<16x64xf32, #tpu.memory_space<vmem>>, vector<16x64xf32>
    %cst = arith.constant dense<0.000000e+00> : vector<16x64xf32>
    %2 = tpu.matmul %0, %1, %cst {dimension_numbers = #tpu.dot_dimension_numbers<[1], [0], [0], [1], [0, 0, 1, 1], [], []>} : vector<16x16xf32>, vector<16x64xf32>, vector<16x64xf32> -> vector<16x64xf32>
    %c0_3 = arith.constant 0 : index
    %c0_4 = arith.constant 0 : index
    %3 = vector.load %arg3[%c0_3, %c0_4] : memref<1x64xf32, #tpu.memory_space<vmem>>, vector<1x64xf32>
    %4 = vector.broadcast %3 : vector<1x64xf32> to vector<16x64xf32>
    %5 = arith.addf %2, %4 : vector<16x64xf32>
    %cst_5 = arith.constant 0.000000e+00 : f32
    %6 = vector.broadcast %cst_5 : f32 to vector<16x64xf32>
    %7 = arith.maximumf %5, %6 : vector<16x64xf32>
    %c0_6 = arith.constant 0 : index
    %c0_7 = arith.constant 0 : index
    %8 = vector.load %arg4[%c0_6, %c0_7] : memref<64x64xf32, #tpu.memory_space<vmem>>, vector<64x64xf32>
    %cst_8 = arith.constant dense<0.000000e+00> : vector<16x64xf32>
    %9 = tpu.matmul %7, %8, %cst_8 {dimension_numbers = #tpu.dot_dimension_numbers<[1], [0], [0], [1], [0, 0, 1, 1], [], []>} : vector<16x64xf32>, vector<64x64xf32>, vector<16x64xf32> -> vector<16x64xf32>
    %c0_9 = arith.constant 0 : index
    %c0_10 = arith.constant 0 : index
    %10 = vector.load %arg5[%c0_9, %c0_10] : memref<1x64xf32, #tpu.memory_space<vmem>>, vector<1x64xf32>
    %11 = vector.broadcast %10 : vector<1x64xf32> to vector<16x64xf32>
    %12 = arith.addf %9, %11 : vector<16x64xf32>
    %c0_11 = arith.constant 0 : index
    %c0_12 = arith.constant 0 : index
    %13 = vector.load %arg6[%c0_11, %c0_12] : memref<64x64xf32, #tpu.memory_space<vmem>>, vector<64x64xf32>
    %cst_13 = arith.constant dense<0.000000e+00> : vector<16x64xf32>
    %14 = tpu.matmul %12, %13, %cst_13 {dimension_numbers = #tpu.dot_dimension_numbers<[1], [0], [0], [1], [0, 0, 1, 1], [], []>} : vector<16x64xf32>, vector<64x64xf32>, vector<16x64xf32> -> vector<16x64xf32>
    %c0_14 = arith.constant 0 : index
    %c0_15 = arith.constant 0 : index
    %15 = vector.load %arg7[%c0_14, %c0_15] : memref<1x64xf32, #tpu.memory_space<vmem>>, vector<1x64xf32>
    %16 = vector.broadcast %15 : vector<1x64xf32> to vector<16x64xf32>
    %17 = arith.addf %14, %16 : vector<16x64xf32>
    %c0_16 = arith.constant 0 : index
    %c0_17 = arith.constant 0 : index
    %18 = vector.load %arg8[%c0_16, %c0_17] : memref<64x128xf32, #tpu.memory_space<vmem>>, vector<64x128xf32>
    %cst_18 = arith.constant dense<0.000000e+00> : vector<16x128xf32>
    %19 = tpu.matmul %17, %18, %cst_18 {dimension_numbers = #tpu.dot_dimension_numbers<[1], [0], [0], [1], [0, 0, 1, 1], [], []>} : vector<16x64xf32>, vector<64x128xf32>, vector<16x128xf32> -> vector<16x128xf32>
    %c0_19 = arith.constant 0 : index
    %c0_20 = arith.constant 0 : index
    %20 = vector.load %arg9[%c0_19, %c0_20] : memref<1x128xf32, #tpu.memory_space<vmem>>, vector<1x128xf32>
    %21 = vector.broadcast %20 : vector<1x128xf32> to vector<16x128xf32>
    %22 = arith.addf %19, %21 : vector<16x128xf32>
    %c0_21 = arith.constant 0 : index
    %c0_22 = arith.constant 0 : index
    %23 = vector.load %arg10[%c0_21, %c0_22] : memref<64x128xf32, #tpu.memory_space<vmem>>, vector<64x128xf32>
    %cst_23 = arith.constant dense<0.000000e+00> : vector<16x128xf32>
    %24 = tpu.matmul %17, %23, %cst_23 {dimension_numbers = #tpu.dot_dimension_numbers<[1], [0], [0], [1], [0, 0, 1, 1], [], []>} : vector<16x64xf32>, vector<64x128xf32>, vector<16x128xf32> -> vector<16x128xf32>
    %c0_24 = arith.constant 0 : index
    %c0_25 = arith.constant 0 : index
    %25 = vector.load %arg11[%c0_24, %c0_25] : memref<1x128xf32, #tpu.memory_space<vmem>>, vector<1x128xf32>
    %26 = vector.broadcast %25 : vector<1x128xf32> to vector<16x128xf32>
    %27 = arith.addf %24, %26 : vector<16x128xf32>
    %c0_26 = arith.constant 0 : index
    %c0_27 = arith.constant 0 : index
    %28 = vector.load %arg12[%c0_26, %c0_27] : memref<64x128xf32, #tpu.memory_space<vmem>>, vector<64x128xf32>
    %cst_28 = arith.constant dense<0.000000e+00> : vector<16x128xf32>
    %29 = tpu.matmul %17, %28, %cst_28 {dimension_numbers = #tpu.dot_dimension_numbers<[1], [0], [0], [1], [0, 0, 1, 1], [], []>} : vector<16x64xf32>, vector<64x128xf32>, vector<16x128xf32> -> vector<16x128xf32>
    %c0_29 = arith.constant 0 : index
    %c0_30 = arith.constant 0 : index
    %30 = vector.load %arg13[%c0_29, %c0_30] : memref<1x128xf32, #tpu.memory_space<vmem>>, vector<1x128xf32>
    %31 = vector.broadcast %30 : vector<1x128xf32> to vector<16x128xf32>
    %32 = arith.addf %29, %31 : vector<16x128xf32>
    %cst_31 = arith.constant 0.000000e+00 : f32
    %33 = vector.broadcast %cst_31 : f32 to vector<16x128xf32>
    %34 = arith.maximumf %22, %33 : vector<16x128xf32>
    %35 = vector.broadcast %cst_31 : f32 to vector<16x128xf32>
    %36 = arith.subf %22, %35 : vector<16x128xf32>
    %37 = arith.cmpf one, %36, %36 : vector<16x128xf32>
    %38 = vector.broadcast %cst_31 : f32 to vector<16x128xf32>
    %39 = arith.addf %22, %38 : vector<16x128xf32>
    %40 = math.absf %36 : vector<16x128xf32>
    %cst_32 = arith.constant 0.000000e+00 : f32
    %41 = vector.broadcast %cst_32 : f32 to vector<16x128xf32>
    %42 = arith.subf %41, %40 : vector<16x128xf32>
    %43 = math.exp %42 : vector<16x128xf32>
    %44 = math.log1p %43 : vector<16x128xf32>
    %45 = arith.addf %34, %44 : vector<16x128xf32>
    %46 = arith.select %37, %39, %45 : vector<16x128xi1>, vector<16x128xf32>
    %cst_33 = arith.constant 0.000000e+00 : f32
    %47 = vector.broadcast %cst_33 : f32 to vector<16x128xf32>
    %48 = arith.maximumf %27, %47 : vector<16x128xf32>
    %49 = vector.broadcast %cst_33 : f32 to vector<16x128xf32>
    %50 = arith.subf %27, %49 : vector<16x128xf32>
    %51 = arith.cmpf one, %50, %50 : vector<16x128xf32>
    %52 = vector.broadcast %cst_33 : f32 to vector<16x128xf32>
    %53 = arith.addf %27, %52 : vector<16x128xf32>
    %54 = math.absf %50 : vector<16x128xf32>
    %cst_34 = arith.constant 0.000000e+00 : f32
    %55 = vector.broadcast %cst_34 : f32 to vector<16x128xf32>
    %56 = arith.subf %55, %54 : vector<16x128xf32>
    %57 = math.exp %56 : vector<16x128xf32>
    %58 = math.log1p %57 : vector<16x128xf32>
    %59 = arith.addf %48, %58 : vector<16x128xf32>
    %60 = arith.select %51, %53, %59 : vector<16x128xi1>, vector<16x128xf32>
    %cst_35 = arith.constant 9.99999974E-5 : f32
    %61 = vector.broadcast %cst_35 : f32 to vector<16x128xf32>
    %62 = arith.addf %60, %61 : vector<16x128xf32>
    %63 = arith.addf %62, %46 : vector<16x128xf32>
    %64 = arith.divf %62, %63 : vector<16x128xf32>
    %c0_36 = arith.constant 0 : index
    %c0_37 = arith.constant 0 : index
    %65 = vector.load %arg14[%c0_36, %c0_37] : memref<16x128xf32, #tpu.memory_space<vmem>>, vector<16x128xf32>
    tpu.vector_store %arg14[%c0_36, %c0_37], %62 {strides = array<i32>} : memref<16x128xf32, #tpu.memory_space<vmem>>, vector<16x128xf32>,
    %cst_38 = arith.constant 9.99999974E-6 : f32
    %cst_39 = arith.constant 0.999989986 : f32
    %66 = vector.broadcast %cst_38 : f32 to vector<16x128xf32>
    %67 = arith.maximumf %66, %64 : vector<16x128xf32>
    %68 = vector.broadcast %cst_39 : f32 to vector<16x128xf32>
    %69 = arith.minimumf %68, %67 : vector<16x128xf32>
    %c0_40 = arith.constant 0 : index
    %c0_41 = arith.constant 0 : index
    %70 = vector.load %arg15[%c0_40, %c0_41] : memref<16x128xf32, #tpu.memory_space<vmem>>, vector<16x128xf32>
    tpu.vector_store %arg15[%c0_40, %c0_41], %69 {strides = array<i32>} : memref<16x128xf32, #tpu.memory_space<vmem>>, vector<16x128xf32>,
    %cst_42 = arith.constant 0.000000e+00 : f32
    %71 = vector.broadcast %cst_42 : f32 to vector<16x128xf32>
    %72 = arith.subf %71, %32 : vector<16x128xf32>
    %73 = math.exp %72 : vector<16x128xf32>
    %cst_43 = arith.constant 1.000000e+00 : f32
    %74 = vector.broadcast %cst_43 : f32 to vector<16x128xf32>
    %75 = arith.addf %74, %73 : vector<16x128xf32>
    %cst_44 = arith.constant 1.000000e+00 : f32
    %76 = vector.broadcast %cst_44 : f32 to vector<16x128xf32>
    %77 = arith.divf %76, %75 : vector<16x128xf32>
    %c0_45 = arith.constant 0 : index
    %c0_46 = arith.constant 0 : index
    %78 = vector.load %arg16[%c0_45, %c0_46] : memref<16x128xf32, #tpu.memory_space<vmem>>, vector<16x128xf32>
    tpu.vector_store %arg16[%c0_45, %c0_46], %77 {strides = array<i32>} : memref<16x128xf32, #tpu.memory_space<vmem>>, vector<16x128xf32>,
    return
  }
  func.func @transform_0(%arg0: i32) -> (i32, i32) {
    %c0_i32 = arith.constant 0 : i32
    %c0_i32_0 = arith.constant 0 : i32
    return %arg0, %c0_i32 : i32, i32
  }
  func.func @transform_1(%arg0: i32) -> (i32, i32) {
    %c0_i32 = arith.constant 0 : i32
    %c0_i32_0 = arith.constant 0 : i32
    %c0_i32_1 = arith.constant 0 : i32
    return %c0_i32, %c0_i32_0 : i32, i32
  }
  func.func @transform_2(%arg0: i32) -> (i32, i32) {
    %c0_i32 = arith.constant 0 : i32
    %c0_i32_0 = arith.constant 0 : i32
    %c0_i32_1 = arith.constant 0 : i32
    return %c0_i32, %c0_i32_0 : i32, i32
  }
  func.func @transform_3(%arg0: i32) -> (i32, i32) {
    %c0_i32 = arith.constant 0 : i32
    %c0_i32_0 = arith.constant 0 : i32
    %c0_i32_1 = arith.constant 0 : i32
    return %c0_i32, %c0_i32_0 : i32, i32
  }
  func.func @transform_4(%arg0: i32) -> (i32, i32) {
    %c0_i32 = arith.constant 0 : i32
    %c0_i32_0 = arith.constant 0 : i32
    %c0_i32_1 = arith.constant 0 : i32
    return %c0_i32, %c0_i32_0 : i32, i32
  }
  func.func @transform_5(%arg0: i32) -> (i32, i32) {
    %c0_i32 = arith.constant 0 : i32
    %c0_i32_0 = arith.constant 0 : i32
    %c0_i32_1 = arith.constant 0 : i32
    return %c0_i32, %c0_i32_0 : i32, i32
  }
  func.func @transform_6(%arg0: i32) -> (i32, i32) {
    %c0_i32 = arith.constant 0 : i32
    %c0_i32_0 = arith.constant 0 : i32
    %c0_i32_1 = arith.constant 0 : i32
    return %c0_i32, %c0_i32_0 : i32, i32
  }
  func.func @transform_7(%arg0: i32) -> (i32, i32) {
    %c0_i32 = arith.constant 0 : i32
    %c0_i32_0 = arith.constant 0 : i32
    %c0_i32_1 = arith.constant 0 : i32
    return %c0_i32, %c0_i32_0 : i32, i32
  }
  func.func @transform_8(%arg0: i32) -> (i32, i32) {
    %c0_i32 = arith.constant 0 : i32
    %c0_i32_0 = arith.constant 0 : i32
    %c0_i32_1 = arith.constant 0 : i32
    return %c0_i32, %c0_i32_0 : i32, i32
  }
  func.func @transform_9(%arg0: i32) -> (i32, i32) {
    %c0_i32 = arith.constant 0 : i32
    %c0_i32_0 = arith.constant 0 : i32
    %c0_i32_1 = arith.constant 0 : i32
    return %c0_i32, %c0_i32_0 : i32, i32
  }
  func.func @transform_10(%arg0: i32) -> (i32, i32) {
    %c0_i32 = arith.constant 0 : i32
    %c0_i32_0 = arith.constant 0 : i32
    %c0_i32_1 = arith.constant 0 : i32
    return %c0_i32, %c0_i32_0 : i32, i32
  }
  func.func @transform_11(%arg0: i32) -> (i32, i32) {
    %c0_i32 = arith.constant 0 : i32
    %c0_i32_0 = arith.constant 0 : i32
    %c0_i32_1 = arith.constant 0 : i32
    return %c0_i32, %c0_i32_0 : i32, i32
  }
  func.func @transform_12(%arg0: i32) -> (i32, i32) {
    %c0_i32 = arith.constant 0 : i32
    %c0_i32_0 = arith.constant 0 : i32
    %c0_i32_1 = arith.constant 0 : i32
    return %c0_i32, %c0_i32_0 : i32, i32
  }
  func.func @transform_13(%arg0: i32) -> (i32, i32) {
    %c0_i32 = arith.constant 0 : i32
    %c0_i32_0 = arith.constant 0 : i32
    return %arg0, %c0_i32 : i32, i32
  }
  func.func @transform_14(%arg0: i32) -> (i32, i32) {
    %c0_i32 = arith.constant 0 : i32
    %c0_i32_0 = arith.constant 0 : i32
    return %arg0, %c0_i32 : i32, i32
  }
  func.func @transform_15(%arg0: i32) -> (i32, i32) {
    %c0_i32 = arith.constant 0 : i32
    %c0_i32_0 = arith.constant 0 : i32
    return %arg0, %c0_i32 : i32, i32
  }
}

</mosaic_0001>

<bundles_post_ra>
// kernel: tpu_custom_call.1
= control target key start
LH: loop header
LB: loop body
LE: loop exit
PB: predicated region body
PF: predicated region fallthrough
CT: control target
= control target key end

     0   :  { %21 = vsyncpa [#allocation3], 0  ;;  %s1725_s0 = inlined_call_operand.hbm [shape: f32[16,16], index: 0, kind: input, shape index: {}]   ;;  %s1726_s1 = inlined_call_operand.hbm [shape: f32[16,64], index: 1, kind: input, shape index: {}]   ;;  %s1727_s2 = inlined_call_operand.vmem [shape: f32[1,64], index: 2, kind: input, shape index: {}]   ;;  %s1728_s3 = inlined_call_operand.hbm [shape: f32[64,64], index: 3, kind: input, shape index: {}]   ;;  %s1729_s4 = inlined_call_operand.vmem [shape: f32[1,64], index: 4, kind: input, shape index: {}]   ;;  %s1730_s5 = inlined_call_operand.hbm [shape: f32[64,64], index: 5, kind: input, shape index: {}]   ;;  %s1731_s6 = inlined_call_operand.vmem [shape: f32[1,64], index: 6, kind: input, shape index: {}]   ;;  %s1732_s7 = inlined_call_operand.hbm [shape: f32[64,128], index: 7, kind: input, shape index: {}]   ;;  %s1733_s8 = inlined_call_operand.vmem [shape: f32[1,128], index: 8, kind: input, shape index: {}]   ;;  %s1734_s9 = inlined_call_operand.hbm [shape: f32[64,128], index: 9, kind: input, shape index: {}]   ;;  %s1735_s10 = inlined_call_operand.vmem [shape: f32[1,128], index: 10, kind: input, shape index: {}]   ;;  %s1736_s11 = inlined_call_operand.hbm [shape: f32[64,128], index: 11, kind: input, shape index: {}]   ;;  %s1737_s12 = inlined_call_operand.vmem [shape: f32[1,128], index: 12, kind: input, shape index: {}]   ;;  %s1738_s13 = inlined_call_operand.hbm [shape: f32[16,128], index: 13, kind: output, shape index: {0}]   ;;  %s1739_s14 = inlined_call_operand.hbm [shape: f32[16,128], index: 14, kind: output, shape index: {1}]   ;;  %s1740_s15 = inlined_call_operand.hbm [shape: f32[16,128], index: 15, kind: output, shape index: {2}]  }
   0x1   :  { %22 = vsyncpa [#allocation6], 0 }
   0x2   :  { %23 = vsyncpa [#allocation9], 0 }
   0x3   :  { %24 = vsyncpa [#allocation12], 0 }
   0x4   :  { %25 = vsyncpa [#allocation4], 0 }
   0x5   :  { %26 = vsyncpa [#allocation16], 0  ;;  %s1391_s18 = smov [#allocation5]   ;;  %s1392_s20 = smov [#allocation8]  }
   0x6   :  { %s44_s19 = sshll.u32 %s1391_s18, 4  ;;  %s72_s21 = sshll.u32 %s1392_s20, 4  ;;  %s45_s19 = int_to_ptr.vmem [resolvable:$true] %s44_s19  ;;  %s1483_s21 = int_to_ptr.vmem [resolvable:$true] %s72_s21 }
   0x7   :  { %s1159_s24 = scalar_lea.hbm %s1726_s1, 256 }
   0x8   :  { %p1160_p0 = scmp.ne.s32.totalorder %s1726_s1, %s1159_s24  ;;  %p1163_p1 = scmp.lt.u32.totalorder %s1159_s24, %s1726_s1 }
   0xa   :  { %p1165_p2 = pnand %p1163_p1, %p1160_p0 }
   0xc   :  { %1168 = shalt.err (!%p1165_p2)
}
   0xd   :  { %s1169_s29 = scalar_lea.vmem %s45_s19, 256  ;;  %p1174_p4 = scmp.lt.s32.totalorder %s45_s19, %s45_s19 }
   0xe   :  { %p1170_p3 = scmp.ne.s32.totalorder %s45_s19, %s1169_s29  ;;  %p1175_p5 = scmp.lt.s32.totalorder %s1169_s29, %s1169_s29 }
  0x10   :  { %p1176_p6 = por %p1175_p5, %p1174_p4 }
  0x12   :  { %p1177_p7 = pnand %p1176_p6, %p1170_p3 }
  0x14   :  { %1180 = shalt.err (!%p1177_p7)
}
  0x15   :  { %s1393_s30 = smov 128   ;;  %s1394_s16 = smov 8  }
  0x16   :  { %50 = dma.hbm_to_vmem [thread:$0]  %s1726_s1, 256, %s45_s19, [#allocation6], %s1393_s30, %s1393_s30, %s1394_s16  }
  0x17   :  { %s1181_s23 = scalar_lea.hbm %s1730_s5, 1024 }
  0x18   :  { %p1182_p8 = scmp.ne.s32.totalorder %s1730_s5, %s1181_s23  ;;  %p1185_p9 = scmp.lt.u32.totalorder %s1181_s23, %s1730_s5 }
  0x1a   :  { %p1187_p10 = pnand %p1185_p9, %p1182_p8 }
  0x1c   :  { %1190 = shalt.err (!%p1187_p10)
}
  0x1d   :  { %s1191_s28 = scalar_lea.vmem %s1483_s21, 1024  ;;  %p1196_p12 = scmp.lt.s32.totalorder %s1483_s21, %s1483_s21 }
  0x1e   :  { %p1192_p11 = scmp.ne.s32.totalorder %s1483_s21, %s1191_s28  ;;  %p1197_p13 = scmp.lt.s32.totalorder %s1191_s28, %s1191_s28 }
  0x20   :  { %p1198_p0 = por %p1197_p13, %p1196_p12 }
  0x22   :  { %p1199_p1 = pnand %p1198_p0, %p1192_p11 }
  0x24   :  { %1202 = shalt.err (!%p1199_p1)
}
  0x25   :  { %78 = dma.hbm_to_vmem [thread:$0]  %s1730_s5, 1024, %s1483_s21, [#allocation9], %s1393_s30, %s1393_s30, %s1394_s16  }
  0x26   :  { %s1395_s29 = smov [#allocation11]   ;;  %s1396_s18 = smov [#allocation2]  }
  0x27   :  { %s100_s17 = sshll.u32 %s1395_s29, 4  ;;  %s32_s20 = sshll.u32 %s1396_s18, 4  ;;  %s101_s17 = int_to_ptr.vmem [resolvable:$true] %s100_s17  ;;  %s1520_s20 = int_to_ptr.vmem [resolvable:$true] %s32_s20 }
  0x28   :  { %s1203_s24 = scalar_lea.hbm %s1734_s9, 1024 }
  0x29   :  { %p1204_p2 = scmp.ne.s32.totalorder %s1734_s9, %s1203_s24  ;;  %p1207_p3 = scmp.lt.u32.totalorder %s1203_s24, %s1734_s9 }
  0x2b   :  { %p1209_p4 = pnand %p1207_p3, %p1204_p2 }
  0x2d   :  { %1212 = shalt.err (!%p1209_p4)
}
  0x2e   :  { %s1213_s5 = scalar_lea.vmem %s101_s17, 1024  ;;  %p1218_p6 = scmp.lt.s32.totalorder %s101_s17, %s101_s17 }
  0x2f   :  { %p1214_p5 = scmp.ne.s32.totalorder %s101_s17, %s1213_s5  ;;  %p1219_p7 = scmp.lt.s32.totalorder %s1213_s5, %s1213_s5 }
  0x31   :  { %p1220_p8 = por %p1219_p7, %p1218_p6 }
  0x33   :  { %p1221_p9 = pnand %p1220_p8, %p1214_p5 }
  0x35   :  { %1224 = shalt.err (!%p1221_p9)
}
  0x36   :  { %106 = dma.hbm_to_vmem [thread:$0]  %s1734_s9, 1024, %s101_s17, [#allocation12], %s1393_s30, %s1393_s30, %s1394_s16  }
  0x37   :  { %s1225_s18 = scalar_lea.hbm %s1725_s0, 256 }
  0x38   :  { %p1226_p10 = scmp.ne.s32.totalorder %s1725_s0, %s1225_s18  ;;  %p1229_p11 = scmp.lt.u32.totalorder %s1225_s18, %s1725_s0 }
  0x3a   :  { %p1231_p12 = pnand %p1229_p11, %p1226_p10 }
  0x3c   :  { %1234 = shalt.err (!%p1231_p12)
}
  0x3d   :  { %s1235_s26 = scalar_lea.vmem %s1520_s20, 256  ;;  %p1240_p0 = scmp.lt.s32.totalorder %s1520_s20, %s1520_s20 }
  0x3e   :  { %p1236_p13 = scmp.ne.s32.totalorder %s1520_s20, %s1235_s26  ;;  %p1241_p1 = scmp.lt.s32.totalorder %s1235_s26, %s1235_s26 }
  0x40   :  { %p1242_p2 = por %p1241_p1, %p1240_p0 }
  0x42   :  { %p1243_p3 = pnand %p1242_p2, %p1236_p13 }
  0x44   :  { %1246 = shalt.err (!%p1243_p3)
}
  0x45   :  { %38 = dma.hbm_to_vmem [thread:$0]  %s1725_s0, 256, %s1520_s20, [#allocation3], %s1393_s30, %s1393_s30, %s1394_s16  }
  0x46   :  { %s1397_s27 = smov [#allocation7]   ;;  %s1398_s5 = smov [#allocation10]  }
  0x47   :  { %s58_s28 = sshll.u32 %s1397_s27, 4  ;;  %s86_s21 = sshll.u32 %s1398_s5, 4  ;;  %s59_s28 = int_to_ptr.vmem [resolvable:$true] %s58_s28  ;;  %s1557_s21 = int_to_ptr.vmem [resolvable:$true] %s86_s21 }
  0x48   :  { %s1247_s29 = scalar_lea.hbm %s1728_s3, 1024 }
  0x49   :  { %p1248_p4 = scmp.ne.s32.totalorder %s1728_s3, %s1247_s29  ;;  %p1251_p5 = scmp.lt.u32.totalorder %s1247_s29, %s1728_s3 }
  0x4b   :  { %p1253_p6 = pnand %p1251_p5, %p1248_p4 }
  0x4d   :  { %1256 = shalt.err (!%p1253_p6)
}
  0x4e   :  { %s1257_s0 = scalar_lea.vmem %s59_s28, 1024  ;;  %p1262_p8 = scmp.lt.s32.totalorder %s59_s28, %s59_s28 }
  0x4f   :  { %p1258_p7 = scmp.ne.s32.totalorder %s59_s28, %s1257_s0  ;;  %p1263_p9 = scmp.lt.s32.totalorder %s1257_s0, %s1257_s0 }
  0x51   :  { %p1264_p10 = por %p1263_p9, %p1262_p8 }
  0x53   :  { %p1265_p11 = pnand %p1264_p10, %p1258_p7 }
  0x55   :  { %1268 = shalt.err (!%p1265_p11)
}
  0x56   :  { %64 = dma.hbm_to_vmem [thread:$0]  %s1728_s3, 1024, %s59_s28, [#allocation6], %s1393_s30, %s1393_s30, %s1394_s16  }
  0x57   :  { %s1269_s17 = scalar_lea.hbm %s1732_s7, 1024 }
  0x58   :  { %p1270_p12 = scmp.ne.s32.totalorder %s1732_s7, %s1269_s17  ;;  %p1273_p13 = scmp.lt.u32.totalorder %s1269_s17, %s1732_s7 }
  0x5a   :  { %p1275_p0 = pnand %p1273_p13, %p1270_p12 }
  0x5c   :  { %1278 = shalt.err (!%p1275_p0)
}
  0x5d   :  { %s1279_s29 = scalar_lea.vmem %s1557_s21, 1024  ;;  %p1284_p2 = scmp.lt.s32.totalorder %s1557_s21, %s1557_s21 }
  0x5e   :  { %p1280_p1 = scmp.ne.s32.totalorder %s1557_s21, %s1279_s29  ;;  %p1285_p3 = scmp.lt.s32.totalorder %s1279_s29, %s1279_s29 }
  0x60   :  { %p1286_p4 = por %p1285_p3, %p1284_p2 }
  0x62   :  { %p1287_p5 = pnand %p1286_p4, %p1280_p1 }
  0x64   :  { %1290 = shalt.err (!%p1287_p5)
}
  0x65   :  { %92 = dma.hbm_to_vmem [thread:$0]  %s1732_s7, 1024, %s1557_s21, [#allocation9], %s1393_s30, %s1393_s30, %s1394_s16  }
  0x66   :  { %s1399_s18 = smov [#allocation13]   ;;  %s1291_s0 = scalar_lea.hbm %s1736_s11, 1024 }
  0x67   :  { %s114_s22 = sshll.u32 %s1399_s18, 4  ;;  %p1292_p6 = scmp.ne.s32.totalorder %s1736_s11, %s1291_s0  ;;  %s115_s22 = int_to_ptr.vmem [resolvable:$true] %s114_s22 }
  0x68   :  { %p1295_p7 = scmp.lt.u32.totalorder %s1291_s0, %s1736_s11 }
  0x6a   :  { %p1297_p8 = pnand %p1295_p7, %p1292_p6 }
  0x6c   :  { %1300 = shalt.err (!%p1297_p8)
}
  0x6d   :  { %s1301_s17 = scalar_lea.vmem %s115_s22, 1024  ;;  %p1306_p10 = scmp.lt.s32.totalorder %s115_s22, %s115_s22 }
  0x6e   :  { %p1302_p9 = scmp.ne.s32.totalorder %s115_s22, %s1301_s17  ;;  %p1307_p11 = scmp.lt.s32.totalorder %s1301_s17, %s1301_s17 }
  0x70   :  { %p1308_p12 = por %p1307_p11, %p1306_p10 }
  0x72   :  { %p1309_p13 = pnand %p1308_p12, %p1302_p9 }
  0x74   :  { %1312 = shalt.err (!%p1309_p13)
}
  0x75   :  { %120 = dma.hbm_to_vmem [thread:$0]  %s1736_s11, 1024, %s115_s22, [#allocation12], %s1393_s30, %s1393_s30, %s1394_s16  }
  0x76   :  { %1379 = dma.done.wait [#allocation3], 256  }
  0x77   :  { %1380 = vsyncadd [#allocation3], 4294967040 }
  0x78   :  { %1381 = dma.done.wait [#allocation6], 1280  }
  0x79   :  { %1382 = vsyncadd [#allocation6], 4294966016 }
  0x7a   :  { %1383 = dma.done.wait [#allocation9], 2048  }
  0x7b   :  { %1384 = vsyncadd [#allocation9], 4294965248 }
  0x7c   :  { %1385 = dma.done.wait [#allocation12], 2048  }
  0x7d   :  { %1386 = vsyncadd [#allocation12], 4294965248  ;;  %vm155_vm0 = vcmask 130048   ;;  %v146_v0 = vld [vmem:[#allocation5] sm:$0xff]  ;;  %v147_v1 = vld [vmem:[#allocation5 + $0x8] sm:$0xff]  ;;  %vm254_vm1 = vcmask 523264  }
  0x7e   :  { %v144_v2 = vld [vmem:[#allocation2] sm:$0xff]  ;;  %v1035_v3 = vpack.c.bf16 %v147_v1, %v146_v0  ;;  %v240_v5 = vld [vmem:[#allocation7 + $0x8] sm:$0xff]  ;;  %v241_v7 = vld [vmem:[#allocation7 + $0x10] sm:$0xff] }
  0x7f   :  { %937 = vmatprep.mubr.msk.f32.mxu0 %vm155_vm0, %v144_v2  ;;  %v239_v4 = vld [vmem:[#allocation7] sm:$0xff]  ;;  %v242_v8 = vld [vmem:[#allocation7 + $0x18] sm:$0xff]  ;;  %v244_v11 = vld [vmem:[#allocation7 + $0x28] sm:$0xff] }
  0x80   :  { %v1039_v6 = vpack.c.bf16 %v240_v5, %v239_v4  ;;  %1036 = vmatprep.subr.bf16.mxu0 %v1035_v3  ;;  %v1043_v9 = vpack.c.bf16 %v242_v8, %v241_v7  ;;  %v243_v10 = vld [vmem:[#allocation7 + $0x20] sm:$0xff]  ;;  %v145_v12 = vld [vmem:[#allocation2 + $0x8] sm:$0xff]  ;;  %v245_v14 = vld [vmem:[#allocation7 + $0x30] sm:$0xff] }
  0x81   :  { %1038 = vmatpush3.bf16.msra.mxu0 %v1035_v3  ;;  %v1047_v13 = vpack.c.bf16 %v244_v11, %v243_v10  ;;  %v246_v15 = vld [vmem:[#allocation7 + $0x38] sm:$0xff]  ;;  %v336_v17 = vld [vmem:[#allocation8] sm:$0xff]  ;;  %v337_v18 = vld [vmem:[#allocation8 + $0x8] sm:$0xff] }
  0x82   :  { %1040 = vmatprep.subr.bf16.mxu1 %v1039_v6  ;;  %v1051_v16 = vpack.c.bf16 %v246_v15, %v245_v14  ;;  %v338_v19 = vld [vmem:[#allocation8 + $0x10] sm:$0xff]  ;;  %v1055_v20 = vpack.c.bf16 %v337_v18, %v336_v17  ;;  %v339_v21 = vld [vmem:[#allocation8 + $0x18] sm:$0xff]  ;;  %v340_v23 = vld [vmem:[#allocation8 + $0x20] sm:$0xff] }
  0x83   :  { %1042 = vmatpush3.bf16.msra.mxu1 %v1039_v6  ;;  %v1059_v22 = vpack.c.bf16 %v339_v21, %v338_v19  ;;  %v341_v24 = vld [vmem:[#allocation8 + $0x28] sm:$0xff]  ;;  %v861_v26 = vld [vmem:[%s1727_s2] ss:$0 sm:$0xff]  ;;  %v342_v33 = vld [vmem:[#allocation8 + $0x30] sm:$0xff] }
  0x84   :  { %1044 = vmatprep.subr.bf16.mxu1 %v1043_v9  ;;  %938 = vmatmul.mubr.msk.f32.vlgmr.msra.gmra.mrb[0].mxu0 %vm155_vm0, %v145_v12  ;;  %v1063_v25 = vpack.c.bf16 %v341_v24, %v340_v23  ;;  %v343_v34 = vld [vmem:[#allocation8 + $0x38] sm:$0xff]  ;;  %v432_v36 = vld [vmem:[#allocation10] sm:$0xff]  ;;  %v433_v37 = vld [vmem:[#allocation10 + $0x8] sm:$0xff] }
  0x85   :  { %1056 = vmatprep.subr.bf16.mxu0 %v1055_v20  ;;  %v1067_v35 = vpack.c.bf16 %v343_v34, %v342_v33  ;;  %v528_v38 = vld [vmem:[#allocation11] sm:$0xff]  ;;  %v1071_v39 = vpack.c.bf16 %v433_v37, %v432_v36  ;;  %v529_v40 = vld [vmem:[#allocation11 + $0x8] sm:$0xff]  ;;  %v434_v41 = vld [vmem:[#allocation10 + $0x10] sm:$0xff] }
  0x86   :  { %1058 = vmatpush3.bf16.msra.mxu0 %v1055_v20  ;;  %v435_v42 = vld [vmem:[#allocation10 + $0x18] sm:$0xff]  ;;  %v1087_v43 = vpack.c.bf16 %v529_v40, %v528_v38  ;;  %v436_v45 = vld [vmem:[#allocation10 + $0x20] sm:$0xff]  ;;  %v437_v46 = vld [vmem:[#allocation10 + $0x28] sm:$0xff] }
  0x87   :  { %1046 = vmatpush3.bf16.msra.mxu1 %v1043_v9  ;;  %1060 = vmatprep.subr.bf16.mxu0 %v1059_v22  ;;  %v1075_v44 = vpack.c.bf16 %v435_v42, %v434_v41  ;;  %v1079_v47 = vpack.c.bf16 %v437_v46, %v436_v45  ;;  %v864_v48 = vld [vmem:[%s1729_s4] ss:$0 sm:$0xff]  ;;  %v530_v50 = vld [vmem:[#allocation11 + $0x10] sm:$0xff]  ;;  %v531_v51 = vld [vmem:[#allocation11 + $0x18] sm:$0xff] }
  0x88   :  { %1048 = vmatprep.subr.bf16.mxu1 %v1047_v13  ;;  %v1091_v55 = vpack.c.bf16 %v531_v51, %v530_v50  ;;  %v532_v56 = vld [vmem:[#allocation11 + $0x20] sm:$0xff]  ;;  %v533_v57 = vld [vmem:[#allocation11 + $0x28] sm:$0xff]  ;;  %v438_v59 = vld [vmem:[#allocation10 + $0x30] sm:$0xff] }
  0x89   :  { %v1095_v58 = vpack.c.bf16 %v533_v57, %v532_v56  ;;  %v439_v60 = vld [vmem:[#allocation10 + $0x38] sm:$0xff]  ;;  %v534_v62 = vld [vmem:[#allocation11 + $0x30] sm:$0xff]  ;;  %v618_v1 = vld [vmem:[#allocation13] sm:$0xff] }
  0x8a   :  { %1062 = vmatpush3.bf16.msra.mxu0 %v1059_v22  ;;  %v1083_v61 = vpack.c.bf16 %v439_v60, %v438_v59  ;;  %v535_v63 = vld [vmem:[#allocation11 + $0x38] sm:$0xff]  ;;  %v619_v2 = vld [vmem:[#allocation13 + $0x8] sm:$0xff]  ;;  %v867_v4 = vld [vmem:[%s1731_s6] ss:$0 sm:$0xff] }
  0x8b   :  { %1050 = vmatpush3.bf16.msra.mxu1 %v1047_v13  ;;  %1064 = vmatprep.subr.bf16.mxu0 %v1063_v25  ;;  %v1099_v0 = vpack.c.bf16 %v535_v63, %v534_v62  ;;  %v1103_v3 = vpack.c.bf16 %v619_v2, %v618_v1  ;;  %v620_v6 = vld [vmem:[#allocation13 + $0x10] sm:$0xff]  ;;  %v621_v7 = vld [vmem:[#allocation13 + $0x18] sm:$0xff]  ;;  %v622_v12 = vld [vmem:[#allocation13 + $0x20] sm:$0xff] }
  0x8c   :  { %1052 = vmatprep.subr.bf16.mxu1 %v1051_v16  ;;  %v1107_v11 = vpack.c.bf16 %v621_v7, %v620_v6  ;;  %v623_v13 = vld [vmem:[#allocation13 + $0x28] sm:$0xff]  ;;  %v624_v15 = vld [vmem:[#allocation13 + $0x30] sm:$0xff]  ;;  %v870_v18 = vld [vmem:[%s1733_s8] ss:$0 sm:$0xff] }
  0x8d   :  { %v1111_v14 = vpack.c.bf16 %v623_v13, %v622_v12  ;;  %v873_v19 = vld [vmem:[%s1735_s10] ss:$0 sm:$0xff] }
  0x8e   :  { %1066 = vmatpush3.bf16.msra.mxu0 %v1063_v25  ;;  %v876_v40 = vld [vmem:[%s1737_s12] ss:$0 sm:$0xff]  ;;  %s1400_s12 = smov [#allocation14]  }
  0x8f   :  { %1054 = vmatpush3.bf16.msra.mxu1 %v1051_v16  ;;  %1068 = vmatprep.subr.bf16.mxu0 %v1067_v35  ;;  %v625_v16 = vld [vmem:[#allocation13 + $0x38] sm:$0xff]  ;;  %s815_s28 = sshll.u32 %s1400_s12, 4  ;;  %s816_s28 = int_to_ptr.vmem [resolvable:$true] %s815_s28 }
  0x90   :  { %1072 = vmatprep.subr.bf16.mxu1 %v1071_v39  ;;  %v1115_v17 = vpack.c.bf16 %v625_v16, %v624_v15  ;;  %s1313_s18 = scalar_lea.vmem %s816_s28, 256  ;;  %p1318_p1 = scmp.lt.s32.totalorder %s816_s28, %s816_s28 }
  0x91   :  { %p1314_p0 = scmp.ne.s32.totalorder %s816_s28, %s1313_s18  ;;  %p1319_p2 = scmp.lt.s32.totalorder %s1313_s18, %s1313_s18 }
  0x92   :  { %1070 = vmatpush3.bf16.msra.mxu0 %v1067_v35 }
  0x93   :  { %1088 = vmatprep.subr.bf16.mxu0 %v1087_v43  ;;  %p1320_p3 = por %p1319_p2, %p1318_p1 }
  0x95   :  { %p1321_p4 = pnand %p1320_p3, %p1314_p0 }
 0x157   :  { %v939_v27 = vpop.f32.mrb[0].mxu0 }
 0x158   :  { %v234_v28 = vadd.f32 %v939_v27, %v861_v26  ;;  %v228_v29 = vpop.f32.mrb[1].mxu0 }
 0x159   :  { %v229_v30 = vadd.f32 %v861_v26, %v228_v29 }
 0x15a   :  { %v238_v32 = vmax.f32 %v234_v28, 0.0 }
 0x15b   :  { %v237_v31 = vmax.f32 %v229_v30, 0.0 }
 0x15d   :  { %956 = vmatprep.mubr.msk.f32.mxu1 %vm254_vm1, %v237_v31 }
 0x15e   :  { %957 = vmatmul.mubr.msk.f32.vlgmr.msra.gmra.mrb[0].mxu1 %vm254_vm1, %v238_v32 }
 0x15f   :  { %1074 = vmatpush3.bf16.msra.mxu1 %v1071_v39 }
 0x160   :  { %1076 = vmatprep.subr.bf16.mxu1 %v1075_v44 }
 0x163   :  { %1078 = vmatpush3.bf16.msra.mxu1 %v1075_v44 }
 0x164   :  { %1080 = vmatprep.subr.bf16.mxu1 %v1079_v47 }
 0x167   :  { %1082 = vmatpush3.bf16.msra.mxu1 %v1079_v47 }
 0x168   :  { %1084 = vmatprep.subr.bf16.mxu1 %v1083_v61 }
 0x16b   :  { %1086 = vmatpush3.bf16.msra.mxu1 %v1083_v61 }
 0x16c   :  { %1104 = vmatprep.subr.bf16.mxu1 %v1103_v3 }
 0x231   :  { %v958_v49 = vpop.f32.mrb[0].mxu1 }
 0x232   :  { %v327_v52 = vpop.f32.mrb[1].mxu1  ;;  %v333_v54 = vadd.f32 %v958_v49, %v864_v48 }
 0x233   :  { %v328_v53 = vadd.f32 %v864_v48, %v327_v52 }
 0x235   :  { %975 = vmatprep.mubr.msk.f32.mxu0 %vm254_vm1, %v328_v53 }
 0x236   :  { %976 = vmatmul.mubr.msk.f32.vlgmr.msra.gmra.mrb[2].mxu0 %vm254_vm1, %v333_v54 }
 0x237   :  { %1090 = vmatpush3.bf16.msra.mxu0 %v1087_v43 }
 0x238   :  { %1092 = vmatprep.subr.bf16.mxu0 %v1091_v55 }
 0x23b   :  { %1094 = vmatpush3.bf16.msra.mxu0 %v1091_v55 }
 0x23c   :  { %1096 = vmatprep.subr.bf16.mxu0 %v1095_v58 }
 0x23f   :  { %1098 = vmatpush3.bf16.msra.mxu0 %v1095_v58 }
 0x240   :  { %1100 = vmatprep.subr.bf16.mxu0 %v1099_v0 }
 0x243   :  { %1102 = vmatpush3.bf16.msra.mxu0 %v1099_v0 }
 0x309   :  { %v977_v5 = vpop.f32.mrb[2].mxu0 }
 0x30a   :  { %v423_v8 = vpop.f32.mrb[3].mxu0  ;;  %v429_v10 = vadd.f32 %v977_v5, %v867_v4 }
 0x30b   :  { %v424_v9 = vadd.f32 %v867_v4, %v423_v8 }
 0x30d   :  { %994 = vmatprep.mubr.msk.f32.mxu1 %vm254_vm1, %v424_v9  ;;  %1013 = vmatprep.mubr.msk.f32.mxu0 %vm254_vm1, %v424_v9 }
 0x30e   :  { %995 = vmatmul.mubr.msk.f32.vlgmr.msra.gmra.mrb[2].mxu1 %vm254_vm1, %v429_v10  ;;  %1014 = vmatmul.mubr.msk.f32.vlgmr.msra.gmra.mrb[4].mxu0 %vm254_vm1, %v429_v10 }
 0x30f   :  { %1106 = vmatpush3.bf16.msra.mxu1 %v1103_v3  ;;  %1032 = vmatprep.mubr.msk.f32.mxu1 %vm254_vm1, %v424_v9 }
 0x310   :  { %1108 = vmatprep.subr.bf16.mxu1 %v1107_v11 }
 0x313   :  { %1110 = vmatpush3.bf16.msra.mxu1 %v1107_v11 }
 0x314   :  { %1112 = vmatprep.subr.bf16.mxu1 %v1111_v14 }
 0x317   :  { %1114 = vmatpush3.bf16.msra.mxu1 %v1111_v14 }
 0x318   :  { %1116 = vmatprep.subr.bf16.mxu1 %v1115_v17 }
 0x31b   :  { %1118 = vmatpush3.bf16.msra.mxu1 %v1115_v17 }
 0x31e   :  { %1033 = vmatmul.mubr.msk.f32.vlgmr.msra.gmra.mrb[4].mxu1 %vm254_vm1, %v429_v10 }
 0x3e1   :  { %v996_v20 = vpop.f32.mrb[2].mxu1  ;;  %v1015_v21 = vpop.f32.mrb[4].mxu0 }
 0x3e2   :  { %v1636_v22 = vadd.f32 %v996_v20, %v870_v18  ;;  %v1638_v23 = vadd.f32 %v1015_v21, %v873_v19  ;;  %v519_v24 = vpop.f32.mrb[3].mxu1  ;;  %v609_v25 = vpop.f32.mrb[5].mxu0 }
 0x3e3   :  { %v1640_v26 = vadd.f32 %v870_v18, %v519_v24  ;;  %v1642_v27 = vadd.f32 %v873_v19, %v609_v25 }
 0x3e4   :  { %v715_v28 = vand.u32 2147483647, %v1636_v22  ;;  %v751_v29 = vand.u32 2147483647, %v1638_v23  ;;  %v709_v6 = vmax.f32 %v1636_v22, 0.0  ;;  %v745_v9 = vmax.f32 %v1638_v23, 0.0 }
 0x3e5   :  { %v714_v31 = vand.u32 2147483647, %v1640_v26  ;;  %v750_v33 = vand.u32 2147483647, %v1642_v27  ;;  %vm747_vm4 = vcmp.ne.f32.partialorder %v1638_v23, %v1638_v23  ;;  %vm711_vm7 = vcmp.ne.f32.partialorder %v1636_v22, %v1636_v22 }
 0x3e6   :  { %v717_v30 = vsub.f32 0.0, %v715_v28  ;;  %v753_v32 = vsub.f32 0.0, %v751_v29  ;;  %vm746_vm8 = vcmp.ne.f32.partialorder %v1642_v27, %v1642_v27  ;;  %vm710_vm9 = vcmp.ne.f32.partialorder %v1640_v26, %v1640_v26 }
 0x3e7   :  { %v716_v35 = vsub.f32 0.0, %v714_v31  ;;  %v752_v37 = vsub.f32 0.0, %v750_v33  ;;  %v708_v31 = vmax.f32 %v1640_v26, 0.0 }
 0x3e8   :  { %v720_v34 = vmul.f32 1.442695, %v717_v30  ;;  %v756_v36 = vmul.f32 1.442695, %v753_v32  ;;  %v744_v32 = vmax.f32 %v1642_v27, 0.0 }
 0x3e9   :  { %v718_v38 = vmul.f32 1.442695, %v716_v35  ;;  %v754_v39 = vmul.f32 1.442695, %v752_v37 }
 0x3ea   :  { %1131 = vpow2.f32 %v720_v34 }
 0x3eb   :  { %1133 = vpow2.f32 %v756_v36 }
 0x3ec   :  { %1135 = vpow2.f32 %v718_v38 }
 0x3ed   :  { %1137 = vpow2.f32 %v754_v39 }
 0x3f1   :  { %v1034_v41 = vpop.f32.mrb[4].mxu1 }
 0x3f2   :  { %v705_v42 = vadd.f32 %v1034_v41, %v876_v40  ;;  %v699_v43 = vpop.f32.mrb[5].mxu1 }
 0x3f3   :  { %v700_v44 = vadd.f32 %v876_v40, %v699_v43 }
 0x3f4   :  { %v1132_v45 = vpop.eup %1131  ;;  %v797_v46 = vsub.f32 0.0, %v705_v42 }
 0x3f5   :  { %v1134_v47 = vpop.eup %1133  ;;  %v731_v48 = vadd.f32 1.0, %v1132_v45  ;;  %v796_v53 = vsub.f32 0.0, %v700_v44  ;;  %v734_v56 = vmul.f32 -0.5, %v1132_v45  ;;  %v737_v62 = vand.u32 2147483647, %v1132_v45 }
 0x3f6   :  { %v1136_v49 = vpop.eup %1135  ;;  %v767_v50 = vadd.f32 1.0, %v1134_v47  ;;  %v800_v54 = vmul.f32 1.442695, %v797_v46  ;;  %v770_v57 = vmul.f32 -0.5, %v1134_v47  ;;  %v773_v0 = vand.u32 2147483647, %v1134_v47 }
 0x3f7   :  { %v1138_v51 = vpop.eup %1137  ;;  %1139 = vlog2.f32 %v731_v48  ;;  %v722_v52 = vadd.f32 1.0, %v1136_v49  ;;  %v798_v58 = vmul.f32 1.442695, %v796_v53  ;;  %v725_v59 = vmul.f32 -0.5, %v1136_v49 }
 0x3f8   :  { %1141 = vlog2.f32 %v767_v50  ;;  %v758_v55 = vadd.f32 1.0, %v1138_v51  ;;  %v761_v60 = vmul.f32 -0.5, %v1138_v51  ;;  %v735_v61 = vadd.f32 1.0, %v734_v56 }
 0x3f9   :  { %1143 = vlog2.f32 %v722_v52  ;;  %v771_v63 = vadd.f32 1.0, %v770_v57  ;;  %v726_v1 = vadd.f32 1.0, %v725_v59  ;;  %v728_v3 = vand.u32 2147483647, %v1136_v49 }
 0x3fa   :  { %1145 = vlog2.f32 %v758_v55  ;;  %v762_v4 = vadd.f32 1.0, %v761_v60  ;;  %v736_v8 = vmul.f32 %v1132_v45, %v735_v61  ;;  %vm738_vm2 = vcmp.lt.f32.partialorder %v737_v62, 0.0004427343 }
 0x3fb   :  { %1147 = vpow2.f32 %v800_v54  ;;  %v772_v12 = vmul.f32 %v1134_v47, %v771_v63  ;;  %v764_v13 = vand.u32 2147483647, %v1138_v51  ;;  %vm774_vm3 = vcmp.lt.f32.partialorder %v773_v0, 0.0004427343 }
 0x3fc   :  { %1149 = vpow2.f32 %v798_v58  ;;  %v727_v16 = vmul.f32 %v1136_v49, %v726_v1  ;;  %vm1655_vm5 = vcmp.lt.f32.partialorder %v728_v3, 0.0004427343  ;;  %v763_v20 = vmul.f32 %v1138_v51, %v762_v4 }
 0x3fd   :  { %vm765_vm6 = vcmp.lt.f32.partialorder %v764_v13, 0.0004427343 }
 0x401   :  { %v1140_v2 = vpop.eup %1139 }
 0x402   :  { %v1142_v5 = vpop.eup %1141  ;;  %v733_v7 = vmul.f32 0.6931472, %v1140_v2 }
 0x403   :  { %v1144_v10 = vpop.eup %1143  ;;  %v769_v11 = vmul.f32 0.6931472, %v1142_v5 }
 0x404   :  { %v739_v14 = vsel %vm738_vm2, %v736_v8, %v733_v7  ;;  %v724_v15 = vmul.f32 0.6931472, %v1144_v10  ;;  %v1146_v17 = vpop.eup %1145 }
 0x405   :  { %v775_v18 = vsel %vm774_vm3, %v772_v12, %v769_v11  ;;  %v1148_v21 = vpop.eup %1147  ;;  %v741_v24 = vadd.f32 %v739_v14, %v709_v6  ;;  %v760_v29 = vmul.f32 0.6931472, %v1146_v17 }
 0x406   :  { %v777_v25 = vadd.f32 %v775_v18, %v745_v9  ;;  %v730_v28 = vsel %vm1655_vm5, %v727_v16, %v724_v15  ;;  %v1150_v30 = vpop.eup %1149  ;;  %v803_v33 = vadd.f32 1.0, %v1148_v21 }
 0x407   :  { %v766_v35 = vsel %vm765_vm6, %v763_v20, %v760_v29  ;;  %v802_v36 = vadd.f32 1.0, %v1150_v30  ;;  %v740_v38 = vadd.f32 %v730_v28, %v708_v31  ;;  %v743_v40 = vsel %vm711_vm7, %v1636_v22, %v741_v24 }
 0x408   :  { %v779_v34 = vsel %vm747_vm4, %v1638_v23, %v777_v25  ;;  %v776_v39 = vadd.f32 %v766_v35, %v744_v32  ;;  %1151 = vrcp.f32 %v803_v33 }
 0x409   :  { %v781_v37 = vadd.f32 0.0001, %v779_v34  ;;  %1153 = vrcp.f32 %v802_v36  ;;  %v742_v43 = vsel %vm710_vm9, %v1640_v26, %v740_v38 }
 0x40a   :  { %v778_v42 = vsel %vm746_vm8, %v1642_v27, %v776_v39 }
 0x40b   :  { %v783_v41 = vadd.f32 %v781_v37, %v743_v40  ;;  %789 = vst [vmem:[#allocation14 + $0x8] sm:$0xff] %v781_v37  ;;  %v780_v23 = vadd.f32 0.0001, %v778_v42 }
 0x40d   :  { %1155 = vrcp.f32 %v783_v41  ;;  %v782_v44 = vadd.f32 %v780_v23, %v742_v43  ;;  %788 = vst [vmem:[#allocation14] sm:$0xff] %v780_v23 }
 0x40e   :  { %1324 = shalt.err (!%p1321_p4)
}
 0x40f   :  { %s1325_s24 = scalar_lea.hbm %s1738_s13, 256 }
 0x410   :  { %p1326_p5 = scmp.ne.s32.totalorder %s1738_s13, %s1325_s24  ;;  %p1329_p6 = scmp.lt.u32.totalorder %s1325_s24, %s1738_s13 }
 0x412   :  { %p1331_p7 = pnand %p1329_p6, %p1326_p5 }
 0x414   :  { %1334 = shalt.err (!%p1331_p7)
}
 0x415   :  { %821 = dma.vmem_to_hbm [thread:$0]  %s816_s28, 256, %s1738_s13, [#allocation4], %s1393_s30, %s1393_s30, %s1394_s16   ;;  %1157 = vrcp.f32 %v782_v44  ;;  %v1152_v22 = vpop.eup %1151 }
 0x416   :  { %v1154_v26 = vpop.eup %1153  ;;  %809 = vst [vmem:[#allocation17 + $0x8] sm:$0xff] %v1152_v22  ;;  %s1401_s7 = smov [#allocation15]   ;;  %s1402_s11 = smov [#allocation17]  }
 0x417   :  { %808 = vst [vmem:[#allocation17] sm:$0xff] %v1154_v26  ;;  %v1156_v27 = vpop.eup %1155  ;;  %s827_s21 = sshll.u32 %s1401_s7, 4  ;;  %s839_s27 = sshll.u32 %s1402_s11, 4  ;;  %s828_s21 = int_to_ptr.vmem [resolvable:$true] %s827_s21  ;;  %s1688_s27 = int_to_ptr.vmem [resolvable:$true] %s839_s27 }
 0x418   :  { %v787_v45 = vmul.f32 %v1156_v27, %v781_v37  ;;  %s1335_s13 = scalar_lea.vmem %s828_s21, 256  ;;  %p1340_p9 = scmp.lt.s32.totalorder %s828_s21, %s828_s21 }
 0x419   :  { %p1336_p8 = scmp.ne.s32.totalorder %s828_s21, %s1335_s13  ;;  %p1341_p10 = scmp.lt.s32.totalorder %s1335_s13, %s1335_s13 }
 0x41a   :  { %v791_v47 = vmax.f32 %v787_v45, 1e-05 }
 0x41b   :  { %p1342_p11 = por %p1341_p10, %p1340_p9 }
 0x41c   :  { %v793_v49 = vmin.f32 %v791_v47, 0.99999 }
 0x41d   :  { %p1343_p12 = pnand %p1342_p11, %p1336_p8 }
 0x41e   :  { %795 = vst [vmem:[#allocation15 + $0x8] sm:$0xff] %v793_v49 }
 0x41f   :  { %v1158_v46 = vpop.eup %1157 }
 0x420   :  { %v785_v48 = vmul.f32 %v1158_v46, %v780_v23 }
 0x422   :  { %v790_v50 = vmax.f32 %v785_v48, 1e-05 }
 0x424   :  { %v792_v51 = vmin.f32 %v790_v50, 0.99999 }
 0x426   :  { %794 = vst [vmem:[#allocation15] sm:$0xff] %v792_v51 }
 0x427   :  { %1346 = shalt.err (!%p1343_p12)
}
 0x428   :  { %s1347_s4 = scalar_lea.hbm %s1739_s14, 256 }
 0x429   :  { %p1348_p13 = scmp.ne.s32.totalorder %s1739_s14, %s1347_s4  ;;  %p1351_p0 = scmp.lt.u32.totalorder %s1347_s4, %s1739_s14 }
 0x42b   :  { %p1353_p1 = pnand %p1351_p0, %p1348_p13 }
 0x42d   :  { %1356 = shalt.err (!%p1353_p1)
}
 0x42e   :  { %833 = dma.vmem_to_hbm [thread:$0]  %s828_s21, 256, %s1739_s14, [#allocation16], %s1393_s30, %s1393_s30, %s1394_s16  }
 0x42f   :  { %s1357_s10 = scalar_lea.vmem %s1688_s27, 256  ;;  %p1362_p3 = scmp.lt.s32.totalorder %s1688_s27, %s1688_s27 }
 0x430   :  { %p1358_p2 = scmp.ne.s32.totalorder %s1688_s27, %s1357_s10  ;;  %p1363_p4 = scmp.lt.s32.totalorder %s1357_s10, %s1357_s10 }
 0x432   :  { %p1364_p5 = por %p1363_p4, %p1362_p3 }
 0x434   :  { %p1365_p6 = pnand %p1364_p5, %p1358_p2 }
 0x436   :  { %1368 = shalt.err (!%p1365_p6)
}
 0x437   :  { %s1369_s18 = scalar_lea.hbm %s1740_s15, 256 }
 0x438   :  { %p1370_p7 = scmp.ne.s32.totalorder %s1740_s15, %s1369_s18  ;;  %p1373_p8 = scmp.lt.u32.totalorder %s1369_s18, %s1740_s15 }
 0x43a   :  { %p1375_p9 = pnand %p1373_p8, %p1370_p7 }
 0x43c   :  { %1378 = shalt.err (!%p1375_p9)
}
 0x43d   :  { %845 = dma.vmem_to_hbm [thread:$0]  %s1688_s27, 256, %s1740_s15, [#allocation16], %s1393_s30, %s1393_s30, %s1394_s16  }
 0x43e   :  { %1387 = dma.done.wait [#allocation4], 256  }
 0x43f   :  { %1388 = vsyncadd [#allocation4], 4294967040 }
 0x440   :  { %1389 = dma.done.wait [#allocation16], 512  }
 0x441   :  { %1390 = vsyncadd [#allocation16], 4294966784 }
 0x442   :  { %855 = vsyncpa [#allocation3], 1 }
 0x443   :  { %856 = vsyncpa [#allocation6], 1 }
 0x444   :  { %857 = vsyncpa [#allocation9], 1 }
 0x445   :  { %858 = vsyncpa [#allocation12], 1 }
 0x446   :  { %859 = vsyncpa [#allocation4], 1 }
 0x447   :  { %860 = vsyncpa [#allocation16], 1 }

</bundles_post_ra>
